<compile_context>
chip_gen: v7x
topology: tpu7x:2x2x1
jax: 0.10.0
libtpu: 0.0.40
codegen_flags: <defaults>
</compile_context>

<pallas_src>
import functools

import jax
import jax.numpy as jnp
from jax.experimental import pallas as pl
from jax.experimental.pallas import tpu as pltpu


def _mask_and_fill(x, ubits, threshold, out_ref, mask_ref):
    """Shared elementwise core: integer-threshold Bernoulli mask + masked fill."""
    mask = ubits < jnp.uint32(threshold)          # P(mask) = threshold / 2**32 ~= drop_p
    out_ref[...] = jnp.where(mask, jnp.zeros_like(x), x)
    # int8 writeback (4x smaller than int32); converted to bool in the wrapper.
    # TODO(synk): emit jnp.bool_ directly once bool VMEM refs are guaranteed on
    # every target toolchain; that would drop the (cheap) int8->bool XLA pass.
    mask_ref[...] = mask.astype(jnp.int8)


def _unit_mask_kernel_tpu(seed_ref, x_ref, out_ref, mask_ref, *, threshold):
    # Per-tile seed: a constant seed would make every grid step regenerate the
    # identical random stream (all tiles would share one mask pattern).
    pltpu.prng_seed(seed_ref[0] + pl.program_id(0))
    bits = pltpu.prng_random_bits(x_ref.shape)
    if bits.dtype != jnp.uint32:
        bits = pltpu.bitcast(bits, jnp.uint32)
    _mask_and_fill(x_ref[...], bits, threshold, out_ref, mask_ref)


def _unit_mask_kernel_bits(bits_ref, x_ref, out_ref, mask_ref, *, threshold):
    _mask_and_fill(x_ref[...], bits_ref[...], threshold, out_ref, mask_ref)


def _pick_block_rows(rows, cols):
    """Rows per tile: big enough to reach HBM roofline, small enough for v7x VMEM."""
    # ~9 live bytes/element per block (f32 in + f32 out + i8 mask); BlockSpec
    # double-buffers, so keep one block under ~8 MiB (resident < ~16-24 MiB).
    budget_bytes = 8 * 1024 * 1024
    max_rows = max(32, budget_bytes // (9 * max(cols, 1)))
    target = min(512, max_rows)
    if rows <= target:
        return rows                    # single full-extent block along rows
    return (target // 32) * 32         # multiple of 32: friendly to int8 tiling


def unit_mask(x, drop_p, seed):
    """Pallas equivalent of UnitMask(drop_p)(x) -> (x_masked, mask)."""
    b, n = x.shape

    # Lane-dense layout: if num_units is not a multiple of 128 but the total
    # element count is, give the kernel a (rows, 128) view so output stores are
    # full-lane (avoids masked partial stores). Pure layout change (elementwise op).
    rows, cols = b, n
    if (n % 128 != 0) and ((b * n) % 128 == 0):
        rows, cols = (b * n) // 128, 128
    x_work = x.reshape(rows, cols)

    block_rows = _pick_block_rows(rows, cols)
    grid = (pl.cdiv(rows, block_rows),)

    threshold = int(round(float(drop_p) * (1 << 32)))
    threshold = max(0, min(threshold, (1 << 32) - 1))

    def data_spec():
        return pl.BlockSpec((block_rows, cols), lambda i: (i, 0))

    out_shape = (
        jax.ShapeDtypeStruct((rows, cols), x.dtype),
        jax.ShapeDtypeStruct((rows, cols), jnp.int8),
    )
    out_specs = (data_spec(), data_spec())

    if jax.default_backend() == "tpu":
        seed_arr = jnp.asarray([seed], dtype=jnp.int32)
        x_masked, mask_i8 = pl.pallas_call(
            functools.partial(_unit_mask_kernel_tpu, threshold=threshold),
            grid=grid,
            in_specs=[
                pl.BlockSpec(memory_space=pltpu.MemorySpace.SMEM),   # seed scalar
                data_spec(),                                         # x tile
            ],
            out_specs=out_specs,
            out_shape=out_shape,
            compiler_params=pltpu.CompilerParams(
                dimension_semantics=("parallel",),    # v7x: shard tiles over 2 TCs
                vmem_limit_bytes=32 * 1024 * 1024,    # explicit, v7x-safe limit
            ),
        )(seed_arr, x_work)
    else:
        # Portable path: the stateful TPU PRNG primitives have no lowering
        # off-TPU, so draw the uint32 bits with jax.random outside the kernel.
        bits = jax.random.bits(jax.random.PRNGKey(seed), (rows, cols), jnp.uint32)
        x_masked, mask_i8 = pl.pallas_call(
            functools.partial(_unit_mask_kernel_bits, threshold=threshold),
            grid=grid,
            in_specs=[data_spec(), data_spec()],
            out_specs=out_specs,
            out_shape=out_shape,
        )(bits, x_work)

    x_masked = x_masked.reshape(b, n)
    mask = (mask_i8 != 0).reshape(b, n)
    return x_masked, mask


if __name__ == "__main__":
    key = jax.random.PRNGKey(0)
    batch, num_units = 8, 128            # s_b * n_u
    drop_p = 0.3

    x = jax.random.normal(key, (batch, num_units), dtype=jnp.float32)

    x_masked, mask = unit_mask(x, drop_p, seed=42)
    jax.block_until_ready((x_masked, mask))

    assert x_masked.shape == (batch, num_units) and x_masked.dtype == x.dtype
    assert mask.shape == (batch, num_units) and mask.dtype == jnp.bool_
    # Every masked position must be exactly zero; unmasked positions unchanged.
    assert bool(jnp.all(jnp.where(mask, x_masked == 0.0, x_masked == x)))
    # Mask-rate sanity (1024 draws at p=0.3: bounds are >10 sigma wide).
    rate = float(jnp.mean(mask.astype(jnp.float32)))
    assert 0.05 < rate < 0.6, rate

    print("KERNEL_OK")
</pallas_src>

<mosaic_0001>
module attributes {stable_mosaic.version = 11 : i64} {
  func.func @_unit_mask_kernel_bits(%arg0: i32, %arg1: memref<8x128xi32, #tpu.memory_space<vmem>>, %arg2: memref<8x128xf32, #tpu.memory_space<vmem>>, %arg3: memref<8x128xf32, #tpu.memory_space<vmem>>, %arg4: memref<8x128xi8, #tpu.memory_space<vmem>>) attributes {dimension_semantics = [#tpu.dimension_semantics<arbitrary>], iteration_bounds = array<i64: 1>, scalar_prefetch = 0 : i64, scratch_operands = 0 : i64, tpu.core_type = #tpu.core_type<tc>, window_params = [{transform_indices = @transform_0, window_bounds = array<i64: 8, 128>}, {transform_indices = @transform_1, window_bounds = array<i64: 8, 128>}, {transform_indices = @transform_2, window_bounds = array<i64: 8, 128>}, {transform_indices = @transform_3, window_bounds = array<i64: 8, 128>}]} {
    %c0 = arith.constant 0 : index
    %c0_0 = arith.constant 0 : index
    %0 = vector.load %arg2[%c0, %c0_0] : memref<8x128xf32, #tpu.memory_space<vmem>>, vector<8x128xf32>
    %c0_1 = arith.constant 0 : index
    %c0_2 = arith.constant 0 : index
    %1 = vector.load %arg1[%c0_1, %c0_2] : memref<8x128xi32, #tpu.memory_space<vmem>>, vector<8x128xi32>
    %c1288490189_i32 = arith.constant 1288490189 : i32
    %2 = vector.broadcast %c1288490189_i32 : i32 to vector<8x128xi32>
    %3 = arith.cmpi ult, %1, %2 : vector<8x128xi32>
    %cst = arith.constant 0.000000e+00 : f32
    %4 = vector.broadcast %cst : f32 to vector<8x128xf32>
    %5 = arith.select %3, %4, %0 : vector<8x128xi1>, vector<8x128xf32>
    %c0_3 = arith.constant 0 : index
    %c0_4 = arith.constant 0 : index
    %6 = vector.load %arg3[%c0_3, %c0_4] : memref<8x128xf32, #tpu.memory_space<vmem>>, vector<8x128xf32>
    tpu.vector_store %arg3[%c0_3, %c0_4], %5 {strides = array<i32>} : memref<8x128xf32, #tpu.memory_space<vmem>>, vector<8x128xf32>,
    %7 = arith.extui %3 : vector<8x128xi1> to vector<8x128xi8>
    %c0_5 = arith.constant 0 : index
    %c0_6 = arith.constant 0 : index
    %8 = vector.load %arg4[%c0_5, %c0_6] : memref<8x128xi8, #tpu.memory_space<vmem>>, vector<8x128xi8>
    tpu.vector_store %arg4[%c0_5, %c0_6], %7 {strides = array<i32>} : memref<8x128xi8, #tpu.memory_space<vmem>>, vector<8x128xi8>,
    return
  }
  func.func @transform_0(%arg0: i32) -> (i32, i32) {
    %c0_i32 = arith.constant 0 : i32
    %c0_i32_0 = arith.constant 0 : i32
    return %arg0, %c0_i32 : i32, i32
  }
  func.func @transform_1(%arg0: i32) -> (i32, i32) {
    %c0_i32 = arith.constant 0 : i32
    %c0_i32_0 = arith.constant 0 : i32
    return %arg0, %c0_i32 : i32, i32
  }
  func.func @transform_2(%arg0: i32) -> (i32, i32) {
    %c0_i32 = arith.constant 0 : i32
    %c0_i32_0 = arith.constant 0 : i32
    return %arg0, %c0_i32 : i32, i32
  }
  func.func @transform_3(%arg0: i32) -> (i32, i32) {
    %c0_i32 = arith.constant 0 : i32
    %c0_i32_0 = arith.constant 0 : i32
    return %arg0, %c0_i32 : i32, i32
  }
}

</mosaic_0001>

<bundles_post_ra>
// kernel: tpu_custom_call.1
= control target key start
LH: loop header
LB: loop body
LE: loop exit
PB: predicated region body
PF: predicated region fallthrough
CT: control target
= control target key end

     0   :  { %9 = vsyncpa [#allocation3], 0  ;;  %s261_s0 = inlined_call_operand.hbm [shape: u32[8,128], index: 0, kind: input, shape index: {}]   ;;  %s262_s1 = inlined_call_operand.hbm [shape: f32[8,128], index: 1, kind: input, shape index: {}]   ;;  %s263_s2 = inlined_call_operand.hbm [shape: f32[8,128], index: 2, kind: output, shape index: {0}]   ;;  %s264_s3 = inlined_call_operand.hbm [shape: s8[8,128], index: 3, kind: output, shape index: {1}]  }
   0x1   :  { %10 = vsyncpa [#allocation6], 0 }
   0x2   :  { %11 = vsyncpa [#allocation4], 0 }
   0x3   :  { %12 = vsyncpa [#allocation9], 0  ;;  %s181_s12 = smov [#allocation2]   ;;  %s182_s14 = smov [#allocation5]  }
   0x4   :  { %s19_s13 = sshll.u32 %s181_s12, 4  ;;  %s29_s15 = sshll.u32 %s182_s14, 4  ;;  %s20_s13 = int_to_ptr.vmem [resolvable:$true] %s19_s13  ;;  %s30_s15 = int_to_ptr.vmem [resolvable:$true] %s29_s15 }
   0x5   :  { %s85_s18 = scalar_lea.hbm %s261_s0, 128 }
   0x6   :  { %p86_p0 = scmp.ne.s32.totalorder %s261_s0, %s85_s18  ;;  %p89_p1 = scmp.lt.u32.totalorder %s85_s18, %s261_s0 }
   0x8   :  { %p91_p2 = pnand %p89_p1, %p86_p0 }
   0xa   :  { %94 = shalt.err (!%p91_p2)
}
   0xb   :  { %s95_s23 = scalar_lea.vmem %s20_s13, 128  ;;  %p100_p4 = scmp.lt.s32.totalorder %s20_s13, %s20_s13 }
   0xc   :  { %p96_p3 = scmp.ne.s32.totalorder %s20_s13, %s95_s23  ;;  %p101_p5 = scmp.lt.s32.totalorder %s95_s23, %s95_s23 }
   0xe   :  { %p102_p6 = por %p101_p5, %p100_p4 }
  0x10   :  { %p103_p7 = pnand %p102_p6, %p96_p3 }
  0x12   :  { %106 = shalt.err (!%p103_p7)
}
  0x13   :  { %22 = dma.hbm_to_vmem [thread:$0]  %s261_s0, 128, %s20_s13, [#allocation3]  }
  0x14   :  { %s107_s28 = scalar_lea.hbm %s262_s1, 128 }
  0x15   :  { %p108_p8 = scmp.ne.s32.totalorder %s262_s1, %s107_s28  ;;  %p111_p9 = scmp.lt.u32.totalorder %s107_s28, %s262_s1 }
  0x17   :  { %p113_p10 = pnand %p111_p9, %p108_p8 }
  0x19   :  { %116 = shalt.err (!%p113_p10)
}
  0x1a   :  { %s117_s6 = scalar_lea.vmem %s30_s15, 128  ;;  %p122_p12 = scmp.lt.s32.totalorder %s30_s15, %s30_s15 }
  0x1b   :  { %p118_p11 = scmp.ne.s32.totalorder %s30_s15, %s117_s6  ;;  %p123_p13 = scmp.lt.s32.totalorder %s117_s6, %s117_s6 }
  0x1d   :  { %p124_p0 = por %p123_p13, %p122_p12 }
  0x1f   :  { %p125_p1 = pnand %p124_p0, %p118_p11 }
  0x21   :  { %128 = shalt.err (!%p125_p1)
}
  0x22   :  { %32 = dma.hbm_to_vmem [thread:$0]  %s262_s1, 128, %s30_s15, [#allocation6]  }
  0x23   :  { %173 = dma.done.wait [#allocation3], 128  }
  0x24   :  { %174 = vsyncadd [#allocation3], 4294967168 }
  0x25   :  { %175 = dma.done.wait [#allocation6], 128  }
  0x26   :  { %176 = vsyncadd [#allocation6], 4294967168  ;;  %s183_s8 = smov [#allocation7]   ;;  %v41_v0 = vld [vmem:[#allocation5] sm:$0xff]  ;;  %v42_v1 = vld [vmem:[#allocation2] sm:$0xff]  ;;  %s184_s10 = smov [#allocation8]  }
  0x27   :  { %s56_s9 = sshll.u32 %s183_s8, 4  ;;  %s66_s11 = sshll.u32 %s184_s10, 4  ;;  %vm43_vm0 = vcmp.lt.u32.totalorder %v42_v1, 1288490189  ;;  %v185_v3 = vmov 0   ;;  %s57_s9 = int_to_ptr.vmem [resolvable:$true] %s56_s9  ;;  %s230_s11 = int_to_ptr.vmem [resolvable:$true] %s66_s11 }
  0x28   :  { %v44_v2 = vsel %vm43_vm0, 0.0, %v41_v0  ;;  %vm46_vm1 = vmpackc.low %vm43_vm0, %vm43_vm0  ;;  %s129_s1 = scalar_lea.vmem %s57_s9, 128  ;;  %p134_p3 = scmp.lt.s32.totalorder %s57_s9, %s57_s9 }
  0x29   :  { %45 = vst [vmem:[#allocation7] sm:$0xff] %v44_v2  ;;  %vm47_vm2 = vmpackc.even %vm46_vm1, %vm46_vm1  ;;  %p130_p2 = scmp.ne.s32.totalorder %s57_s9, %s129_s1  ;;  %p135_p4 = scmp.lt.s32.totalorder %s129_s1, %s129_s1 }
  0x2a   :  { %v48_v4 = vsel %vm47_vm2, 16843009, %v185_v3 }
  0x2b   :  { %p136_p5 = por %p135_p4, %p134_p3 }
  0x2d   :  { %p137_p6 = pnand %p136_p5, %p130_p2 }
  0x2f   :  { %140 = shalt.err (!%p137_p6)
}
  0x30   :  { %s141_s14 = scalar_lea.hbm %s263_s2, 128 }
  0x31   :  { %p142_p7 = scmp.ne.s32.totalorder %s263_s2, %s141_s14  ;;  %p145_p8 = scmp.lt.u32.totalorder %s141_s14, %s263_s2 }
  0x33   :  { %p147_p9 = pnand %p145_p8, %p142_p7 }
  0x35   :  { %150 = shalt.err (!%p147_p9)
}
  0x36   :  { %59 = dma.vmem_to_hbm [thread:$0]  %s57_s9, 128, %s263_s2, [#allocation4]   ;;  %49 = vst [vmem:[#allocation8] sm:$0x3] %v48_v4 }
  0x37   :  { %s151_s21 = scalar_lea.vmem %s230_s11, 32  ;;  %p156_p11 = scmp.lt.s32.totalorder %s230_s11, %s230_s11 }
  0x38   :  { %p152_p10 = scmp.ne.s32.totalorder %s230_s11, %s151_s21  ;;  %p157_p12 = scmp.lt.s32.totalorder %s151_s21, %s151_s21 }
  0x3a   :  { %p158_p13 = por %p157_p12, %p156_p11 }
  0x3c   :  { %p159_p0 = pnand %p158_p13, %p152_p10 }
  0x3e   :  { %162 = shalt.err (!%p159_p0)
}
  0x3f   :  { %s163_s24 = scalar_lea.hbm %s264_s3, 32 }
  0x40   :  { %p164_p1 = scmp.ne.s32.totalorder %s264_s3, %s163_s24  ;;  %p167_p2 = scmp.lt.u32.totalorder %s163_s24, %s264_s3 }
  0x42   :  { %p169_p3 = pnand %p167_p2, %p164_p1 }
  0x44   :  { %172 = shalt.err (!%p169_p3)
}
  0x45   :  { %69 = dma.vmem_to_hbm [thread:$0]  %s230_s11, 32, %s264_s3, [#allocation9]  }
  0x46   :  { %177 = dma.done.wait [#allocation4], 128  }
  0x47   :  { %178 = vsyncadd [#allocation4], 4294967168 }
  0x48   :  { %179 = dma.done.wait [#allocation9], 32  }
  0x49   :  { %180 = vsyncadd [#allocation9], 4294967264 }
  0x4a   :  { %76 = vsyncpa [#allocation3], 1 }
  0x4b   :  { %77 = vsyncpa [#allocation6], 1 }
  0x4c   :  { %78 = vsyncpa [#allocation4], 1 }
  0x4d   :  { %79 = vsyncpa [#allocation9], 1 }

</bundles_post_ra>
